<compile_context>
chip_gen: v7x
topology: tpu7x:2x2x1
jax: 0.10.0
libtpu: 0.0.40
codegen_flags: <defaults>
</compile_context>

<pallas_src>
import functools

import jax
import jax.numpy as jnp
from jax import lax
from jax.experimental import pallas as pl
from jax.experimental.pallas import tpu as pltpu


def _mha_kernel(x_ref, wqkv_ref, wproj_ref, bproj_ref, o_ref, concat_ref,
                *, n_heads, head_size):
    """One grid step == one block of Bb batch elements."""
    bb, T, C = x_ref.shape
    HS = n_heads * head_size
    scale = head_size ** -0.5

    # ---- fused QKV projection: one wide, lane-dense MXU matmul ------------
    # Flatten batch-block * sequence into the M dimension (fills MXU rows).
    x = x_ref[...].reshape(bb * T, C).astype(jnp.bfloat16)
    qkv = jnp.dot(x, wqkv_ref[...], preferred_element_type=jnp.float32)  # (bb*T, 3*HS) f32
    qkv = qkv.reshape(bb, T, 3 * HS)

    # Fold the attention scale into q once (cheaper than scaling (T,T) scores).
    q = (qkv[:, :, 0:HS] * scale).astype(jnp.bfloat16)        # (bb, T, HS)
    k = qkv[:, :, HS:2 * HS].astype(jnp.bfloat16)             # (bb, T, HS)
    v = qkv[:, :, 2 * HS:3 * HS].astype(jnp.bfloat16)         # (bb, T, HS)

    # Causal mask (>=2D iota required on TPU).
    row = lax.broadcasted_iota(jnp.int32, (T, T), 0)
    col = lax.broadcasted_iota(jnp.int32, (T, T), 1)
    causal = (col <= row)[None]                               # (1, T, T)

    # ---- per-head scores / softmax / PV (batched over the batch-block) ----
    # Static unroll over heads is fine here: q/k/v of other heads are just lane
    # slices of the shared slabs, so vreg pressure stays bounded.
    for h in range(n_heads):
        lo = h * head_size
        hi = lo + head_size
        qh = q[:, :, lo:hi]                                   # (bb, T, hs) bf16
        kh = k[:, :, lo:hi]
        vh = v[:, :, lo:hi]

        s = jnp.einsum('bqd,bkd->bqk', qh, kh,
                       preferred_element_type=jnp.float32)    # (bb, T, T) f32
        s = jnp.where(causal, s, -1e30)

        # Numerically-stable softmax in f32; denom via approx reciprocal (EUP).
        s = s - jnp.max(s, axis=-1, keepdims=True)
        p = jnp.exp(s)
        inv = pl.reciprocal(jnp.sum(p, axis=-1, keepdims=True), approx=True)
        wei = (p * inv).astype(jnp.bfloat16)

        head_out = jnp.einsum('bqk,bkd->bqd', wei, vh,
                              preferred_element_type=jnp.float32)  # (bb, T, hs)

        # "concat heads" into the scratch buffer (lane slice store).
        concat_ref[:, lo:hi] = head_out.reshape(bb * T, head_size)

    # ---- single fused output projection -----------------------------------
    concat = concat_ref[...].astype(jnp.bfloat16)             # (bb*T, HS)
    out = jnp.dot(concat, wproj_ref[...],
                  preferred_element_type=jnp.float32)         # (bb*T, C) f32
    out = out + bproj_ref[0].astype(jnp.float32)
    o_ref[...] = out.reshape(bb, T, C).astype(o_ref.dtype)


def _pick_batch_block(B, T, target_rows=128):
    """Largest divisor of B such that bb*T ~>= target_rows (fills MXU M dim)."""
    bb = max(1, min(B, -(-target_rows // T)))
    while B % bb:
        bb -= 1
    return bb


def multi_head_attention(x, w_qkv, w_proj, b_proj, *, n_heads, head_size,
                         batch_block=None):
    """x: (B, T, C) f32; w_qkv: (C, 3*H*hs) bf16; w_proj: (H*hs, C) bf16;
    b_proj: (1, C) f32. Returns (B, T, C) in x.dtype."""
    B, T, C = x.shape
    HS = n_heads * head_size
    assert w_qkv.shape == (C, 3 * HS)
    assert w_proj.shape == (HS, C)
    assert b_proj.shape == (1, C)

    bb = _pick_batch_block(B, T) if batch_block is None else batch_block
    assert B % bb == 0

    kernel = functools.partial(_mha_kernel, n_heads=n_heads, head_size=head_size)

    # NOTE: weights are lane-dense (trailing dim = 3*H*hs / C), stored in bf16 in
    # HBM, so weight DMA moves no lane padding and the MXU gets bf16 inputs.
    # Demo tiles are tiny; no explicit vmem_limit_bytes needed here.
    return pl.pallas_call(
        kernel,
        out_shape=jax.ShapeDtypeStruct((B, T, C), x.dtype),
        grid_spec=pltpu.PrefetchScalarGridSpec(
            num_scalar_prefetch=0,
            grid=(B // bb,),
            in_specs=[
                pl.BlockSpec((bb, T, C), lambda b: (b, 0, 0)),   # x (batch block)
                pl.BlockSpec((C, 3 * HS), lambda b: (0, 0)),     # fused W_qkv
                pl.BlockSpec((HS, C), lambda b: (0, 0)),         # W_proj
                pl.BlockSpec((1, C), lambda b: (0, 0)),          # proj bias
            ],
            out_specs=pl.BlockSpec((bb, T, C), lambda b: (b, 0, 0)),
            scratch_shapes=[pltpu.VMEM((bb * T, HS), jnp.float32)],  # concat buffer
        ),
        compiler_params=pltpu.CompilerParams(
            dimension_semantics=("parallel",),
        ),
    )(x, w_qkv, w_proj, b_proj)


def _reference(x, w_qkv, w_proj, b_proj, n_heads, head_size):
    """Pure-JAX f32 reference mirroring the PyTorch module semantics."""
    B, T, C = x.shape
    HS = n_heads * head_size
    scale = head_size ** -0.5
    causal = jnp.tril(jnp.ones((T, T), dtype=bool))

    qkv = x @ w_qkv                                     # (B, T, 3*HS)
    q, k, v = qkv[..., :HS], qkv[..., HS:2 * HS], qkv[..., 2 * HS:]

    head_outs = []
    for h in range(n_heads):
        lo, hi = h * head_size, (h + 1) * head_size
        s = jnp.einsum('btd,bsd->bts', q[..., lo:hi], k[..., lo:hi]) * scale
        s = jnp.where(causal[None], s, -jnp.inf)
        wei = jax.nn.softmax(s, axis=-1)
        head_outs.append(jnp.einsum('bts,bsd->btd', wei, v[..., lo:hi]))
    concat = jnp.concatenate(head_outs, axis=-1)        # (B, T, H*hs)
    return concat @ w_proj + b_proj[0]


if __name__ == "__main__":
    # Small, module-consistent shapes (block_size=8, n_heads=4, head_size=8).
    B = 2
    T = 8
    n_heads = 4
    head_size = 8
    C = n_heads * head_size   # n_embeddings = 32

    key = jax.random.PRNGKey(0)
    kx, kq, kk, kv, kp, kb = jax.random.split(key, 6)

    x = jax.random.normal(kx, (B, T, C), dtype=jnp.float32)

    # PyTorch-like init: uniform(-1/sqrt(fan_in), 1/sqrt(fan_in)).
    lim = 1.0 / (C ** 0.5)
    wq = jax.random.uniform(kq, (n_heads, C, head_size), jnp.float32, -lim, lim)
    wk = jax.random.uniform(kk, (n_heads, C, head_size), jnp.float32, -lim, lim)
    wv = jax.random.uniform(kv, (n_heads, C, head_size), jnp.float32, -lim, lim)
    wproj = jax.random.uniform(kp, (C, C), jnp.float32, -lim, lim)  # (in, out)
    bproj = jax.random.uniform(kb, (C,), jnp.float32, -lim, lim)

    # Pack per-head weights into the fused, lane-dense layouts:
    #   W_qkv = [Wq_all | Wk_all | Wv_all], each (C, H*hs) with head h in cols [h*hs:(h+1)*hs]
    w_q_all = jnp.transpose(wq, (1, 0, 2)).reshape(C, n_heads * head_size)
    w_k_all = jnp.transpose(wk, (1, 0, 2)).reshape(C, n_heads * head_size)
    w_v_all = jnp.transpose(wv, (1, 0, 2)).reshape(C, n_heads * head_size)
    w_qkv = jnp.concatenate([w_q_all, w_k_all, w_v_all], axis=1)   # (C, 3*H*hs)
    b_proj2d = bproj.reshape(1, C)

    out = multi_head_attention(
        x,
        w_qkv.astype(jnp.bfloat16),
        wproj.astype(jnp.bfloat16),
        b_proj2d,
        n_heads=n_heads,
        head_size=head_size,
    )
    out = jax.block_until_ready(out)

    ref = _reference(x, w_qkv, wproj, b_proj2d, n_heads, head_size)
    assert out.shape == (B, T, C)
    # Tolerance accounts for bf16 matmul inputs (f32 accumulation) vs f32 reference.
    assert jnp.allclose(out, ref, atol=5e-2, rtol=5e-2), "kernel mismatch vs reference"

    print("KERNEL_OK")
</pallas_src>

<mosaic_0001>
module attributes {stable_mosaic.version = 11 : i64} {
  func.func @_mha_kernel(%arg0: i32, %arg1: memref<2x8x32xf32, #tpu.memory_space<vmem>>, %arg2: memref<32x96xbf16, #tpu.memory_space<vmem>>, %arg3: memref<32x32xbf16, #tpu.memory_space<vmem>>, %arg4: memref<1x32xf32, #tpu.memory_space<vmem>>, %arg5: memref<2x8x32xf32, #tpu.memory_space<vmem>>, %arg6: memref<16x32xf32, #tpu.memory_space<vmem>>) attributes {dimension_semantics = [#tpu.dimension_semantics<parallel>], iteration_bounds = array<i64: 1>, scalar_prefetch = 0 : i64, scratch_operands = 1 : i64, tpu.core_type = #tpu.core_type<tc>, window_params = [{transform_indices = @transform_0, window_bounds = array<i64: 2, 8, 32>}, {pipeline_mode = #tpu.pipeline_mode<synchronous>, transform_indices = @transform_1, window_bounds = array<i64: 32, 96>}, {pipeline_mode = #tpu.pipeline_mode<synchronous>, transform_indices = @transform_2, window_bounds = array<i64: 32, 32>}, {pipeline_mode = #tpu.pipeline_mode<synchronous>, transform_indices = @transform_3, window_bounds = array<i64: 1, 32>}, {transform_indices = @transform_4, window_bounds = array<i64: 2, 8, 32>}]} {
    %c0 = arith.constant 0 : index
    %c0_0 = arith.constant 0 : index
    %c0_1 = arith.constant 0 : index
    %0 = vector.load %arg1[%c0, %c0_0, %c0_1] : memref<2x8x32xf32, #tpu.memory_space<vmem>>, vector<2x8x32xf32>
    %1 = vector.shape_cast %0 : vector<2x8x32xf32> to vector<16x32xf32>
    %2 = arith.truncf %1 : vector<16x32xf32> to vector<16x32xbf16>
    %c0_2 = arith.constant 0 : index
    %c0_3 = arith.constant 0 : index
    %3 = vector.load %arg2[%c0_2, %c0_3] : memref<32x96xbf16, #tpu.memory_space<vmem>>, vector<32x96xbf16>
    %cst = arith.constant dense<0.000000e+00> : vector<16x96xf32>
    %4 = tpu.matmul %2, %3, %cst {dimension_numbers = #tpu.dot_dimension_numbers<[1], [0], [0], [1], [0, 0, 1, 1], [], []>} : vector<16x32xbf16>, vector<32x96xbf16>, vector<16x96xf32> -> vector<16x96xf32>
    %5 = vector.shape_cast %4 : vector<16x96xf32> to vector<2x8x96xf32>
    %6 = vector.extract_strided_slice %5 {offsets = [0, 0, 0], sizes = [2, 8, 32], strides = [1, 1, 1]} : vector<2x8x96xf32> to vector<2x8x32xf32>
    %cst_4 = arith.constant 0.353553385 : f32
    %7 = vector.broadcast %cst_4 : f32 to vector<2x8x32xf32>
    %8 = arith.mulf %6, %7 : vector<2x8x32xf32>
    %9 = arith.truncf %8 : vector<2x8x32xf32> to vector<2x8x32xbf16>
    %10 = vector.extract_strided_slice %5 {offsets = [0, 0, 32], sizes = [2, 8, 32], strides = [1, 1, 1]} : vector<2x8x96xf32> to vector<2x8x32xf32>
    %11 = arith.truncf %10 : vector<2x8x32xf32> to vector<2x8x32xbf16>
    %12 = vector.extract_strided_slice %5 {offsets = [0, 0, 64], sizes = [2, 8, 32], strides = [1, 1, 1]} : vector<2x8x96xf32> to vector<2x8x32xf32>
    %13 = arith.truncf %12 : vector<2x8x32xf32> to vector<2x8x32xbf16>
    %14 = tpu.iota {dimensions = array<i32: 0>} : vector<8x8xi32>
    %15 = tpu.iota {dimensions = array<i32: 1>} : vector<8x8xi32>
    %16 = arith.cmpi sle, %15, %14 : vector<8x8xi32>
    %17 = vector.shape_cast %16 : vector<8x8xi1> to vector<1x8x8xi1>
    %18 = vector.extract_strided_slice %9 {offsets = [0, 0, 0], sizes = [2, 8, 8], strides = [1, 1, 1]} : vector<2x8x32xbf16> to vector<2x8x8xbf16>
    %19 = vector.extract_strided_slice %11 {offsets = [0, 0, 0], sizes = [2, 8, 8], strides = [1, 1, 1]} : vector<2x8x32xbf16> to vector<2x8x8xbf16>
    %20 = vector.extract_strided_slice %13 {offsets = [0, 0, 0], sizes = [2, 8, 8], strides = [1, 1, 1]} : vector<2x8x32xbf16> to vector<2x8x8xbf16>
    "tpu.trace_start"() <{level = 10 : i32, message = "bqd,bkd->bqk"}> : () -> ()
    %cst_5 = arith.constant dense<0.000000e+00> : vector<2x8x8xf32>
    %21 = tpu.matmul %18, %19, %cst_5 {dimension_numbers = #tpu.dot_dimension_numbers<[2], [2], [1], [1], [0, 0, 0, 1, 1, 1], [0], [0]>} : vector<2x8x8xbf16>, vector<2x8x8xbf16>, vector<2x8x8xf32> -> vector<2x8x8xf32>
    %cst_6 = arith.constant -1.000000e+30 : f32
    "tpu.trace_stop"() : () -> ()
    %22 = vector.shape_cast %17 : vector<1x8x8xi1> to vector<1x8x8xi1>
    %23 = vector.broadcast %22 : vector<1x8x8xi1> to vector<2x8x8xi1>
    %24 = vector.broadcast %cst_6 : f32 to vector<2x8x8xf32>
    %25 = arith.select %23, %21, %24 : vector<2x8x8xi1>, vector<2x8x8xf32>
    %cst_7 = arith.constant dense<0xFF800000> : vector<2x8xf32>
    %26 = vector.multi_reduction <maximumf>, %25, %cst_7 [2] : vector<2x8x8xf32> to vector<2x8xf32>
    %27 = vector.shape_cast %26 : vector<2x8xf32> to vector<2x8x1xf32>
    %28 = vector.broadcast %27 : vector<2x8x1xf32> to vector<2x8x8xf32>
    %29 = arith.subf %25, %28 : vector<2x8x8xf32>
    %30 = math.exp %29 : vector<2x8x8xf32>
    %cst_8 = arith.constant dense<0.000000e+00> : vector<2x8xf32>
    %31 = vector.multi_reduction <add>, %30, %cst_8 [2] : vector<2x8x8xf32> to vector<2x8xf32>
    %32 = vector.shape_cast %31 : vector<2x8xf32> to vector<2x8x1xf32>
    %33 = tpu.reciprocal %32 {approx = true} : vector<2x8x1xf32> -> vector<2x8x1xf32>
    %34 = vector.broadcast %33 : vector<2x8x1xf32> to vector<2x8x8xf32>
    %35 = arith.mulf %30, %34 : vector<2x8x8xf32>
    %36 = arith.truncf %35 : vector<2x8x8xf32> to vector<2x8x8xbf16>
    "tpu.trace_start"() <{level = 10 : i32, message = "bqk,bkd->bqd"}> : () -> ()
    %cst_9 = arith.constant dense<0.000000e+00> : vector<2x8x8xf32>
    %37 = tpu.matmul %36, %20, %cst_9 {dimension_numbers = #tpu.dot_dimension_numbers<[2], [1], [1], [2], [0, 0, 0, 1, 1, 2], [0], [0]>} : vector<2x8x8xbf16>, vector<2x8x8xbf16>, vector<2x8x8xf32> -> vector<2x8x8xf32>
    "tpu.trace_stop"() : () -> ()
    %38 = vector.shape_cast %37 : vector<2x8x8xf32> to vector<16x8xf32>
    %c0_10 = arith.constant 0 : index
    %c0_11 = arith.constant 0 : index
    %39 = vector.load %arg6[%c0_10, %c0_11] : memref<16x32xf32, #tpu.memory_space<vmem>>, vector<16x8xf32>
    tpu.vector_store %arg6[%c0_10, %c0_11], %38 {strides = array<i32>} : memref<16x32xf32, #tpu.memory_space<vmem>>, vector<16x8xf32>,
    %40 = vector.extract_strided_slice %9 {offsets = [0, 0, 8], sizes = [2, 8, 8], strides = [1, 1, 1]} : vector<2x8x32xbf16> to vector<2x8x8xbf16>
    %41 = vector.extract_strided_slice %11 {offsets = [0, 0, 8], sizes = [2, 8, 8], strides = [1, 1, 1]} : vector<2x8x32xbf16> to vector<2x8x8xbf16>
    %42 = vector.extract_strided_slice %13 {offsets = [0, 0, 8], sizes = [2, 8, 8], strides = [1, 1, 1]} : vector<2x8x32xbf16> to vector<2x8x8xbf16>
    "tpu.trace_start"() <{level = 10 : i32, message = "bqd,bkd->bqk"}> : () -> ()
    %cst_12 = arith.constant dense<0.000000e+00> : vector<2x8x8xf32>
    %43 = tpu.matmul %40, %41, %cst_12 {dimension_numbers = #tpu.dot_dimension_numbers<[2], [2], [1], [1], [0, 0, 0, 1, 1, 1], [0], [0]>} : vector<2x8x8xbf16>, vector<2x8x8xbf16>, vector<2x8x8xf32> -> vector<2x8x8xf32>
    %cst_13 = arith.constant -1.000000e+30 : f32
    "tpu.trace_stop"() : () -> ()
    %44 = vector.shape_cast %17 : vector<1x8x8xi1> to vector<1x8x8xi1>
    %45 = vector.broadcast %44 : vector<1x8x8xi1> to vector<2x8x8xi1>
    %46 = vector.broadcast %cst_13 : f32 to vector<2x8x8xf32>
    %47 = arith.select %45, %43, %46 : vector<2x8x8xi1>, vector<2x8x8xf32>
    %cst_14 = arith.constant dense<0xFF800000> : vector<2x8xf32>
    %48 = vector.multi_reduction <maximumf>, %47, %cst_14 [2] : vector<2x8x8xf32> to vector<2x8xf32>
    %49 = vector.shape_cast %48 : vector<2x8xf32> to vector<2x8x1xf32>
    %50 = vector.broadcast %49 : vector<2x8x1xf32> to vector<2x8x8xf32>
    %51 = arith.subf %47, %50 : vector<2x8x8xf32>
    %52 = math.exp %51 : vector<2x8x8xf32>
    %cst_15 = arith.constant dense<0.000000e+00> : vector<2x8xf32>
    %53 = vector.multi_reduction <add>, %52, %cst_15 [2] : vector<2x8x8xf32> to vector<2x8xf32>
    %54 = vector.shape_cast %53 : vector<2x8xf32> to vector<2x8x1xf32>
    %55 = tpu.reciprocal %54 {approx = true} : vector<2x8x1xf32> -> vector<2x8x1xf32>
    %56 = vector.broadcast %55 : vector<2x8x1xf32> to vector<2x8x8xf32>
    %57 = arith.mulf %52, %56 : vector<2x8x8xf32>
    %58 = arith.truncf %57 : vector<2x8x8xf32> to vector<2x8x8xbf16>
    "tpu.trace_start"() <{level = 10 : i32, message = "bqk,bkd->bqd"}> : () -> ()
    %cst_16 = arith.constant dense<0.000000e+00> : vector<2x8x8xf32>
    %59 = tpu.matmul %58, %42, %cst_16 {dimension_numbers = #tpu.dot_dimension_numbers<[2], [1], [1], [2], [0, 0, 0, 1, 1, 2], [0], [0]>} : vector<2x8x8xbf16>, vector<2x8x8xbf16>, vector<2x8x8xf32> -> vector<2x8x8xf32>
    "tpu.trace_stop"() : () -> ()
    %60 = vector.shape_cast %59 : vector<2x8x8xf32> to vector<16x8xf32>
    %c0_17 = arith.constant 0 : index
    %c8 = arith.constant 8 : index
    %61 = vector.load %arg6[%c0_17, %c8] : memref<16x32xf32, #tpu.memory_space<vmem>>, vector<16x8xf32>
    tpu.vector_store %arg6[%c0_17, %c8], %60 {strides = array<i32>} : memref<16x32xf32, #tpu.memory_space<vmem>>, vector<16x8xf32>,
    %62 = vector.extract_strided_slice %9 {offsets = [0, 0, 16], sizes = [2, 8, 8], strides = [1, 1, 1]} : vector<2x8x32xbf16> to vector<2x8x8xbf16>
    %63 = vector.extract_strided_slice %11 {offsets = [0, 0, 16], sizes = [2, 8, 8], strides = [1, 1, 1]} : vector<2x8x32xbf16> to vector<2x8x8xbf16>
    %64 = vector.extract_strided_slice %13 {offsets = [0, 0, 16], sizes = [2, 8, 8], strides = [1, 1, 1]} : vector<2x8x32xbf16> to vector<2x8x8xbf16>
    "tpu.trace_start"() <{level = 10 : i32, message = "bqd,bkd->bqk"}> : () -> ()
    %cst_18 = arith.constant dense<0.000000e+00> : vector<2x8x8xf32>
    %65 = tpu.matmul %62, %63, %cst_18 {dimension_numbers = #tpu.dot_dimension_numbers<[2], [2], [1], [1], [0, 0, 0, 1, 1, 1], [0], [0]>} : vector<2x8x8xbf16>, vector<2x8x8xbf16>, vector<2x8x8xf32> -> vector<2x8x8xf32>
    %cst_19 = arith.constant -1.000000e+30 : f32
    "tpu.trace_stop"() : () -> ()
    %66 = vector.shape_cast %17 : vector<1x8x8xi1> to vector<1x8x8xi1>
    %67 = vector.broadcast %66 : vector<1x8x8xi1> to vector<2x8x8xi1>
    %68 = vector.broadcast %cst_19 : f32 to vector<2x8x8xf32>
    %69 = arith.select %67, %65, %68 : vector<2x8x8xi1>, vector<2x8x8xf32>
    %cst_20 = arith.constant dense<0xFF800000> : vector<2x8xf32>
    %70 = vector.multi_reduction <maximumf>, %69, %cst_20 [2] : vector<2x8x8xf32> to vector<2x8xf32>
    %71 = vector.shape_cast %70 : vector<2x8xf32> to vector<2x8x1xf32>
    %72 = vector.broadcast %71 : vector<2x8x1xf32> to vector<2x8x8xf32>
    %73 = arith.subf %69, %72 : vector<2x8x8xf32>
    %74 = math.exp %73 : vector<2x8x8xf32>
    %cst_21 = arith.constant dense<0.000000e+00> : vector<2x8xf32>
    %75 = vector.multi_reduction <add>, %74, %cst_21 [2] : vector<2x8x8xf32> to vector<2x8xf32>
    %76 = vector.shape_cast %75 : vector<2x8xf32> to vector<2x8x1xf32>
    %77 = tpu.reciprocal %76 {approx = true} : vector<2x8x1xf32> -> vector<2x8x1xf32>
    %78 = vector.broadcast %77 : vector<2x8x1xf32> to vector<2x8x8xf32>
    %79 = arith.mulf %74, %78 : vector<2x8x8xf32>
    %80 = arith.truncf %79 : vector<2x8x8xf32> to vector<2x8x8xbf16>
    "tpu.trace_start"() <{level = 10 : i32, message = "bqk,bkd->bqd"}> : () -> ()
    %cst_22 = arith.constant dense<0.000000e+00> : vector<2x8x8xf32>
    %81 = tpu.matmul %80, %64, %cst_22 {dimension_numbers = #tpu.dot_dimension_numbers<[2], [1], [1], [2], [0, 0, 0, 1, 1, 2], [0], [0]>} : vector<2x8x8xbf16>, vector<2x8x8xbf16>, vector<2x8x8xf32> -> vector<2x8x8xf32>
    "tpu.trace_stop"() : () -> ()
    %82 = vector.shape_cast %81 : vector<2x8x8xf32> to vector<16x8xf32>
    %c0_23 = arith.constant 0 : index
    %c16 = arith.constant 16 : index
    %83 = vector.load %arg6[%c0_23, %c16] : memref<16x32xf32, #tpu.memory_space<vmem>>, vector<16x8xf32>
    tpu.vector_store %arg6[%c0_23, %c16], %82 {strides = array<i32>} : memref<16x32xf32, #tpu.memory_space<vmem>>, vector<16x8xf32>,
    %84 = vector.extract_strided_slice %9 {offsets = [0, 0, 24], sizes = [2, 8, 8], strides = [1, 1, 1]} : vector<2x8x32xbf16> to vector<2x8x8xbf16>
    %85 = vector.extract_strided_slice %11 {offsets = [0, 0, 24], sizes = [2, 8, 8], strides = [1, 1, 1]} : vector<2x8x32xbf16> to vector<2x8x8xbf16>
    %86 = vector.extract_strided_slice %13 {offsets = [0, 0, 24], sizes = [2, 8, 8], strides = [1, 1, 1]} : vector<2x8x32xbf16> to vector<2x8x8xbf16>
    "tpu.trace_start"() <{level = 10 : i32, message = "bqd,bkd->bqk"}> : () -> ()
    %cst_24 = arith.constant dense<0.000000e+00> : vector<2x8x8xf32>
    %87 = tpu.matmul %84, %85, %cst_24 {dimension_numbers = #tpu.dot_dimension_numbers<[2], [2], [1], [1], [0, 0, 0, 1, 1, 1], [0], [0]>} : vector<2x8x8xbf16>, vector<2x8x8xbf16>, vector<2x8x8xf32> -> vector<2x8x8xf32>
    %cst_25 = arith.constant -1.000000e+30 : f32
    "tpu.trace_stop"() : () -> ()
    %88 = vector.shape_cast %17 : vector<1x8x8xi1> to vector<1x8x8xi1>
    %89 = vector.broadcast %88 : vector<1x8x8xi1> to vector<2x8x8xi1>
    %90 = vector.broadcast %cst_25 : f32 to vector<2x8x8xf32>
    %91 = arith.select %89, %87, %90 : vector<2x8x8xi1>, vector<2x8x8xf32>
    %cst_26 = arith.constant dense<0xFF800000> : vector<2x8xf32>
    %92 = vector.multi_reduction <maximumf>, %91, %cst_26 [2] : vector<2x8x8xf32> to vector<2x8xf32>
    %93 = vector.shape_cast %92 : vector<2x8xf32> to vector<2x8x1xf32>
    %94 = vector.broadcast %93 : vector<2x8x1xf32> to vector<2x8x8xf32>
    %95 = arith.subf %91, %94 : vector<2x8x8xf32>
    %96 = math.exp %95 : vector<2x8x8xf32>
    %cst_27 = arith.constant dense<0.000000e+00> : vector<2x8xf32>
    %97 = vector.multi_reduction <add>, %96, %cst_27 [2] : vector<2x8x8xf32> to vector<2x8xf32>
    %98 = vector.shape_cast %97 : vector<2x8xf32> to vector<2x8x1xf32>
    %99 = tpu.reciprocal %98 {approx = true} : vector<2x8x1xf32> -> vector<2x8x1xf32>
    %100 = vector.broadcast %99 : vector<2x8x1xf32> to vector<2x8x8xf32>
    %101 = arith.mulf %96, %100 : vector<2x8x8xf32>
    %102 = arith.truncf %101 : vector<2x8x8xf32> to vector<2x8x8xbf16>
    "tpu.trace_start"() <{level = 10 : i32, message = "bqk,bkd->bqd"}> : () -> ()
    %cst_28 = arith.constant dense<0.000000e+00> : vector<2x8x8xf32>
    %103 = tpu.matmul %102, %86, %cst_28 {dimension_numbers = #tpu.dot_dimension_numbers<[2], [1], [1], [2], [0, 0, 0, 1, 1, 2], [0], [0]>} : vector<2x8x8xbf16>, vector<2x8x8xbf16>, vector<2x8x8xf32> -> vector<2x8x8xf32>
    "tpu.trace_stop"() : () -> ()
    %104 = vector.shape_cast %103 : vector<2x8x8xf32> to vector<16x8xf32>
    %c0_29 = arith.constant 0 : index
    %c24 = arith.constant 24 : index
    %105 = vector.load %arg6[%c0_29, %c24] : memref<16x32xf32, #tpu.memory_space<vmem>>, vector<16x8xf32>
    tpu.vector_store %arg6[%c0_29, %c24], %104 {strides = array<i32>} : memref<16x32xf32, #tpu.memory_space<vmem>>, vector<16x8xf32>,
    %c0_30 = arith.constant 0 : index
    %c0_31 = arith.constant 0 : index
    %106 = vector.load %arg6[%c0_30, %c0_31] : memref<16x32xf32, #tpu.memory_space<vmem>>, vector<16x32xf32>
    %107 = arith.truncf %106 : vector<16x32xf32> to vector<16x32xbf16>
    %c0_32 = arith.constant 0 : index
    %c0_33 = arith.constant 0 : index
    %108 = vector.load %arg3[%c0_32, %c0_33] : memref<32x32xbf16, #tpu.memory_space<vmem>>, vector<32x32xbf16>
    %cst_34 = arith.constant dense<0.000000e+00> : vector<16x32xf32>
    %109 = tpu.matmul %107, %108, %cst_34 {dimension_numbers = #tpu.dot_dimension_numbers<[1], [0], [0], [1], [0, 0, 1, 1], [], []>} : vector<16x32xbf16>, vector<32x32xbf16>, vector<16x32xf32> -> vector<16x32xf32>
    %c0_35 = arith.constant 0 : index
    %c0_36 = arith.constant 0 : index
    %110 = vector.load %arg4[%c0_35, %c0_36] : memref<1x32xf32, #tpu.memory_space<vmem>>, vector<1x32xf32>
    %111 = vector.shape_cast %110 : vector<1x32xf32> to vector<32xf32>
    %112 = vector.shape_cast %111 : vector<32xf32> to vector<1x32xf32>
    %113 = vector.broadcast %112 : vector<1x32xf32> to vector<16x32xf32>
    %114 = arith.addf %109, %113 : vector<16x32xf32>
    %115 = vector.shape_cast %114 : vector<16x32xf32> to vector<2x8x32xf32>
    %c0_37 = arith.constant 0 : index
    %c0_38 = arith.constant 0 : index
    %c0_39 = arith.constant 0 : index
    %116 = vector.load %arg5[%c0_37, %c0_38, %c0_39] : memref<2x8x32xf32, #tpu.memory_space<vmem>>, vector<2x8x32xf32>
    tpu.vector_store %arg5[%c0_37, %c0_38, %c0_39], %115 {strides = array<i32>} : memref<2x8x32xf32, #tpu.memory_space<vmem>>, vector<2x8x32xf32>,
    return
  }
  func.func @transform_0(%arg0: i32) -> (i32, i32, i32) {
    %c0_i32 = arith.constant 0 : i32
    %c0_i32_0 = arith.constant 0 : i32
    %c0_i32_1 = arith.constant 0 : i32
    return %arg0, %c0_i32, %c0_i32_0 : i32, i32, i32
  }
  func.func @transform_1(%arg0: i32) -> (i32, i32) {
    %c0_i32 = arith.constant 0 : i32
    %c0_i32_0 = arith.constant 0 : i32
    %c0_i32_1 = arith.constant 0 : i32
    return %c0_i32, %c0_i32_0 : i32, i32
  }
  func.func @transform_2(%arg0: i32) -> (i32, i32) {
    %c0_i32 = arith.constant 0 : i32
    %c0_i32_0 = arith.constant 0 : i32
    %c0_i32_1 = arith.constant 0 : i32
    return %c0_i32, %c0_i32_0 : i32, i32
  }
  func.func @transform_3(%arg0: i32) -> (i32, i32) {
    %c0_i32 = arith.constant 0 : i32
    %c0_i32_0 = arith.constant 0 : i32
    %c0_i32_1 = arith.constant 0 : i32
    return %c0_i32, %c0_i32_0 : i32, i32
  }
  func.func @transform_4(%arg0: i32) -> (i32, i32, i32) {
    %c0_i32 = arith.constant 0 : i32
    %c0_i32_0 = arith.constant 0 : i32
    %c0_i32_1 = arith.constant 0 : i32
    return %arg0, %c0_i32, %c0_i32_0 : i32, i32, i32
  }
}

</mosaic_0001>

<bundles_post_ra>
// kernel: tpu_custom_call.1
= control target key start
LH: loop header
LB: loop body
LE: loop exit
PB: predicated region body
PF: predicated region fallthrough
CT: control target
= control target key end

     0   :  { %9 = vsyncpa [#allocation4], 0  ;;  %s1763_s0 = inlined_call_operand.hbm [shape: f32[2,8,32], index: 0, kind: input, shape index: {}]   ;;  %s1764_s1 = inlined_call_operand.hbm [shape: bf16[32,96], index: 1, kind: input, shape index: {}]   ;;  %s1765_s2 = inlined_call_operand.hbm [shape: bf16[32,32], index: 2, kind: input, shape index: {}]   ;;  %s1766_s3 = inlined_call_operand.vmem [shape: f32[1,32], index: 3, kind: input, shape index: {}]   ;;  %s1767_s4 = inlined_call_operand.hbm [shape: f32[2,8,32], index: 4, kind: output, shape index: {}]  }
   0x1   :  { %10 = vsyncpa [#allocation7], 0 }
   0x2   :  { %11 = vsyncpa [#allocation5], 0  ;;  %s1477_s15 = smov [#allocation6]   ;;  %s1383_s19 = scalar_lea.hbm %s1764_s1, 256 }
   0x3   :  { %s29_s16 = sshll.u32 %s1477_s15, 4  ;;  %p1384_p0 = scmp.ne.s32.totalorder %s1764_s1, %s1383_s19  ;;  %s30_s16 = int_to_ptr.vmem [resolvable:$true] %s29_s16 }
   0x4   :  { %p1387_p1 = scmp.lt.u32.totalorder %s1383_s19, %s1764_s1 }
   0x6   :  { %p1389_p2 = pnand %p1387_p1, %p1384_p0 }
   0x8   :  { %1392 = shalt.err (!%p1389_p2)
}
   0x9   :  { %s1393_s24 = scalar_lea.vmem %s30_s16, 256  ;;  %p1398_p4 = scmp.lt.s32.totalorder %s30_s16, %s30_s16 }
   0xa   :  { %p1394_p3 = scmp.ne.s32.totalorder %s30_s16, %s1393_s24  ;;  %p1399_p5 = scmp.lt.s32.totalorder %s1393_s24, %s1393_s24 }
   0xc   :  { %p1400_p6 = por %p1399_p5, %p1398_p4 }
   0xe   :  { %p1401_p7 = pnand %p1400_p6, %p1394_p3 }
  0x10   :  { %1404 = shalt.err (!%p1401_p7)
}
  0x11   :  { %s1478_s25 = smov 64   ;;  %s1479_s26 = smov 4  }
  0x12   :  { %35 = dma.hbm_to_vmem [thread:$0]  %s1764_s1, 256, %s30_s16, [#allocation7], %s1478_s25, %s1478_s25, %s1479_s26  }
  0x13   :  { %s1480_s29 = smov [#allocation3]   ;;  %s1405_s7 = scalar_lea.hbm %s1763_s0, 256 }
  0x14   :  { %s17_s30 = sshll.u32 %s1480_s29, 4  ;;  %p1406_p8 = scmp.ne.s32.totalorder %s1763_s0, %s1405_s7  ;;  %s18_s30 = int_to_ptr.vmem [resolvable:$true] %s17_s30 }
  0x15   :  { %p1409_p9 = scmp.lt.u32.totalorder %s1405_s7, %s1763_s0 }
  0x17   :  { %p1411_p10 = pnand %p1409_p9, %p1406_p8 }
  0x19   :  { %1414 = shalt.err (!%p1411_p10)
}
  0x1a   :  { %s1415_s12 = scalar_lea.vmem %s18_s30, 256  ;;  %p1420_p12 = scmp.lt.s32.totalorder %s18_s30, %s18_s30 }
  0x1b   :  { %p1416_p11 = scmp.ne.s32.totalorder %s18_s30, %s1415_s12  ;;  %p1421_p13 = scmp.lt.s32.totalorder %s1415_s12, %s1415_s12 }
  0x1d   :  { %p1422_p0 = por %p1421_p13, %p1420_p12 }
  0x1f   :  { %p1423_p1 = pnand %p1422_p0, %p1416_p11 }
  0x21   :  { %1426 = shalt.err (!%p1423_p1)
}
  0x22   :  { %s1481_s1 = smov 128   ;;  %s1482_s13 = smov 8  }
  0x23   :  { %23 = dma.hbm_to_vmem [thread:$0]  %s1763_s0, 256, %s18_s30, [#allocation4], %s1481_s1, %s1481_s1, %s1482_s13  }
  0x24   :  { %s1483_s16 = smov [#allocation8]   ;;  %s1427_s20 = scalar_lea.hbm %s1765_s2, 256 }
  0x25   :  { %s41_s17 = sshll.u32 %s1483_s16, 4  ;;  %p1428_p2 = scmp.ne.s32.totalorder %s1765_s2, %s1427_s20  ;;  %s42_s17 = int_to_ptr.vmem [resolvable:$true] %s41_s17 }
  0x26   :  { %p1431_p3 = scmp.lt.u32.totalorder %s1427_s20, %s1765_s2 }
  0x28   :  { %p1433_p4 = pnand %p1431_p3, %p1428_p2 }
  0x2a   :  { %1436 = shalt.err (!%p1433_p4)
}
  0x2b   :  { %s1437_s27 = scalar_lea.vmem %s42_s17, 256  ;;  %p1442_p6 = scmp.lt.s32.totalorder %s42_s17, %s42_s17 }
  0x2c   :  { %p1438_p5 = scmp.ne.s32.totalorder %s42_s17, %s1437_s27  ;;  %p1443_p7 = scmp.lt.s32.totalorder %s1437_s27, %s1437_s27 }
  0x2e   :  { %p1444_p8 = por %p1443_p7, %p1442_p6 }
  0x30   :  { %p1445_p9 = pnand %p1444_p8, %p1438_p5 }
  0x32   :  { %1448 = shalt.err (!%p1445_p9)
}
  0x33   :  { %47 = dma.hbm_to_vmem [thread:$0]  %s1765_s2, 256, %s42_s17, [#allocation7], %s1478_s25, %s1478_s25, %s1479_s26  }
  0x34   :  { %1471 = dma.done.wait [#allocation4], 256  }
  0x35   :  { %1472 = vsyncadd [#allocation4], 4294967040 }
  0x36   :  { %1473 = dma.done.wait [#allocation7], 512  }
  0x37   :  { %1474 = vsyncadd [#allocation7], 4294966784  ;;  %v1484_v0 = vmov 0.0   ;;  %vm1485_vm0 = vmmov 0   ;;  %v1347_v1 = vld [vmem:[#allocation6] sm:$0xff]   ;;  %v1348_v2 = vld [vmem:[#allocation6 + $0x8] sm:$0xff]   ;;  %v130_v20 = vlaneseq }
  0x38   :  { %1213 = vmatprep.subr.bf16.mxu0 %v1484_v0  ;;  %1217 = vmatprep.mubr.msk.bf16.mxu0 %vm1485_vm0, %v1484_v0  ;;  %v60_v3 = vld [vmem:[#allocation3] sm:$0xff]  ;;  %v61_v4 = vld [vmem:[#allocation3 + $0x8] sm:$0xff]  ;;  %vm79_vm1 = vcmask 261120   ;;  %s1486_s2 = smov 96   ;;  %vm138_vm2 = vcmask 64512   ;;  %s1487_s26 = smov 88  }
  0x39   :  { %1221 = vmatprep.subr.bf16.mxu1 %v1484_v0  ;;  %1223 = vmatprep.mubr.msk.bf16.mxu1 %vm1485_vm0, %v1484_v0  ;;  %v62_v5 = vpack.c.bf16 %v61_v4, %v60_v3  ;;  %v131_v21 = vshrl.u32 %v130_v20, 7  ;;  %v133_v22 = vand.u32 127, %v130_v20  ;;  %vm267_vm4 = vcmask 1043456   ;;  %s1489_s29 = smov 56   ;;  %s1490_s30 = smov 80  }
  0x3a   :  { %1214 = vmatpush3.bf16.msra.mxu0 %v1347_v1  ;;  %s1491_s5 = smov 112   ;;  %s1492_s6 = smov 48   ;;  %vm593_vm5 = vcmask 130112   ;;  %vm826_vm6 = vcmask 195712   ;;  %vm1059_vm7 = vcmask 261312  }
  0x3b   :  { %1215 = vmatprep.subr.bf16.mxu0 %v1484_v0  ;;  %vm1602_vm3 = vcmp.le.s32.totalorder %v133_v22, %v131_v21  ;;  %s1493_s7 = smov 72   ;;  %s1494_s8 = smov 104  }
  0x3c   :  { %s1495_s9 = smov 40   ;;  %s1496_s10 = smov 16  }
  0x3d   :  { %s1497_s11 = smov 24   ;;  %s1498_s15 = smov [#allocation9]  }
  0x3e   :  { %1216 = vmatpush3.bf16.msra.mxu0 %v1348_v2  ;;  %s1139_s16 = sshll.u32 %s1498_s15, 4  ;;  %s1140_s16 = int_to_ptr.vmem [resolvable:$true] %s1139_s16 }
  0x3f   :  { %1227 = vmatprep.subr.bf16.mxu0 %v1484_v0  ;;  %s1449_s17 = scalar_lea.vmem %s1140_s16, 256  ;;  %p1454_p11 = scmp.lt.s32.totalorder %s1140_s16, %s1140_s16 }
  0x40   :  { %p1450_p10 = scmp.ne.s32.totalorder %s1140_s16, %s1449_s17  ;;  %p1455_p12 = scmp.lt.s32.totalorder %s1449_s17, %s1449_s17 }
  0x41   :  { %1218 = vmatmul.mubr.msk.bf16.vlgmr.msra.gmra.mrb[0].mxu0 %vm79_vm1, %v62_v5 }
  0x42   :  { %1229 = vmatprep.mubr.msk.bf16.mxu0 %vm1485_vm0, %v1484_v0  ;;  %p1456_p13 = por %p1455_p12, %p1454_p11 }
  0x44   :  { %p1457_p0 = pnand %p1456_p13, %p1450_p10 }
 0x114   :  { %v117_v6 = vpop.f32.mrb[0].mxu0 }
 0x115   :  { %v1580_v7 = vpack.c.bf16 %v117_v6, %v117_v6  ;;  %v1219_v8 = vpop.f32.mrb[1].mxu0  ;;  %v124_v14 = vmul.f32 0.35355338, %v117_v6 }
 0x116   :  { %v120_v9 = vpop.f32.mrb[2].mxu0 }
 0x117   :  { %136 = vrot.lane.b32.xlu0 %v1580_v7, %s1486_s2  ;;  %v1220_v10 = vpop.f32.mrb[3].mxu0  ;;  %v1583_v11 = vpack.c.bf16 %v120_v9, %v120_v9  ;;  %v1589_v17 = vpack.c.bf16 %v124_v14, %v124_v14  ;;  %v125_v18 = vmul.f32 0.35355338, %v120_v9 }
 0x119   :  { %v1596_v19 = vpack.c.bf16 %v125_v18, %v125_v18 }
 0x11b   :  { %186 = vrot.lane.b32.xlu0 %v1583_v11, %s1486_s2 }
 0x189   :  { %v137_v12 = vpop.permute.xlu0 %136 }
 0x18a   :  { %v143_v13 = vsel %vm138_vm2, %v137_v12, 0 }
 0x18b   :  { %1222 = vmatpush3.bf16.xpose.msra.mxu1 %v143_v13 }
 0x18c   :  { %1233 = vmatprep.subr.bf16.mxu1 %v1484_v0 }
 0x18d   :  { %v187_v15 = vpop.permute.xlu0 %186 }
 0x18e   :  { %v192_v16 = vsel %vm138_vm2, %v187_v15, 0 }
 0x18f   :  { %1228 = vmatpush3.bf16.xpose.msra.mxu0 %v192_v16 }
 0x190   :  { %1239 = vmatprep.subr.bf16.mxu0 %v1484_v0 }
 0x192   :  { %1224 = vmatmul.mubr.msk.bf16.vlgmr.msra.gmra.mrb[0].mxu1 %vm138_vm2, %v1589_v17 }
 0x193   :  { %1235 = vmatprep.mubr.msk.bf16.mxu1 %vm1485_vm0, %v1484_v0 }
 0x196   :  { %1230 = vmatmul.mubr.msk.bf16.vlgmr.msra.gmra.mrb[4].mxu0 %vm138_vm2, %v1596_v19 }
 0x197   :  { %1241 = vmatprep.mubr.msk.bf16.mxu0 %vm1485_vm0, %v1484_v0 }
 0x265   :  { %v179_v24 = vpop.f32.mrb[0].mxu1 }
 0x266   :  { %v236_v25 = vsel %vm1602_vm3, %v179_v24, -1e+30  ;;  %v1225_v26 = vpop.f32.mrb[1].mxu1 }
 0x267   :  { %v182_v27 = vpop.f32.mrb[2].mxu1  ;;  %v238_v28 = vsel %vm138_vm2, %v236_v25, -inf }
 0x268   :  { %239 = vmax.xlane.f32.xlu1 %v238_v28  ;;  %v1226_v29 = vpop.f32.mrb[3].mxu1 }
 0x269   :  { %v228_v30 = vpop.f32.mrb[4].mxu0 }
 0x26a   :  { %v237_v31 = vsel %vm1602_vm3, %v228_v30, -1e+30  ;;  %v1231_v32 = vpop.f32.mrb[5].mxu0 }
 0x26b   :  { %v231_v33 = vpop.f32.mrb[6].mxu0  ;;  %v241_v34 = vsel %vm138_vm2, %v237_v31, -inf }
 0x26c   :  { %242 = vmax.xlane.f32.xlu1 %v241_v34  ;;  %v1232_v35 = vpop.f32.mrb[7].mxu0 }
 0x27d   :  { %262 = vrot.lane.b32.xlu1 %v1580_v7, %s1478_s25 }
 0x281   :  { %311 = vrot.lane.b32.xlu1 %v1583_v11, %s1478_s25  ;;  %s1488_s25 = smov 120  }
 0x285   :  { %364 = vrot.lane.b32.xlu1 %v1580_v7, %s1487_s26 }
 0x2f5   :  { %v240_v36 = vpop.xlane.xlu1 %239 }
 0x2f6   :  { %v244_v37 = vsub.f32 %v236_v25, %v240_v36 }
 0x2f8   :  { %v246_v38 = vmul.f32 1.442695, %v244_v37 }
 0x2f9   :  { %v243_v39 = vpop.xlane.xlu1 %242 }
 0x2fa   :  { %1351 = vpow2.f32 %v246_v38  ;;  %v245_v40 = vsub.f32 %v237_v31, %v243_v39 }
 0x2fc   :  { %v248_v41 = vmul.f32 1.442695, %v245_v40 }
 0x2fd   :  { %v263_v42 = vpop.permute.xlu1 %262 }
 0x2fe   :  { %1353 = vpow2.f32 %v248_v41  ;;  %v269_v43 = vsel %vm267_vm4, %v263_v42, 0 }
 0x2ff   :  { %1234 = vmatpush3.bf16.msra.mxu1 %v269_v43 }
 0x300   :  { %1245 = vmatprep.subr.bf16.mxu1 %v1484_v0 }
 0x301   :  { %v312_v44 = vpop.permute.xlu1 %311 }
 0x302   :  { %v317_v45 = vsel %vm267_vm4, %v312_v44, 0 }
 0x303   :  { %1240 = vmatpush3.bf16.msra.mxu0 %v317_v45 }
 0x304   :  { %v1352_v46 = vpop.eup %1351  ;;  %1251 = vmatprep.subr.bf16.mxu0 %v1484_v0 }
 0x305   :  { %v250_v47 = vsel %vm138_vm2, %v1352_v46, 0.0  ;;  %v365_v50 = vpop.permute.xlu1 %364 }
 0x306   :  { %251 = vadd.xlane.f32.xlu0 %v250_v47  ;;  %v370_v57 = vsel %vm138_vm2, %v365_v50, 0 }
 0x308   :  { %v1354_v48 = vpop.eup %1353 }
 0x309   :  { %v253_v49 = vsel %vm138_vm2, %v1354_v48, 0.0 }
 0x30a   :  { %254 = vadd.xlane.f32.xlu1 %v253_v49 }
 0x31b   :  { %415 = vrot.lane.b32.xlu1 %v1583_v11, %s1487_s26 }
 0x31c   :  { %362 = vrot.lane.b32.xlu0 %v1589_v17, %s1488_s25 }
 0x31f   :  { %413 = vrot.lane.b32.xlu1 %v1596_v19, %s1488_s25 }
 0x393   :  { %v252_v51 = vpop.xlane.xlu0 %251 }
 0x394   :  { %1355 = vrcp.f32 %v252_v51 }
 0x397   :  { %v255_v52 = vpop.xlane.xlu1 %254  ;;  %v363_v62 = vpop.permute.xlu0 %362 }
 0x398   :  { %1357 = vrcp.f32 %v255_v52 }
 0x39b   :  { %v416_v59 = vpop.permute.xlu1 %415 }
 0x39c   :  { %v421_v61 = vsel %vm138_vm2, %v416_v59, 0 }
 0x39e   :  { %v1356_v53 = vpop.eup %1355 }
 0x39f   :  { %v258_v54 = vmul.f32 %v1356_v53, %v1352_v46  ;;  %v414_v63 = vpop.permute.xlu1 %413 }
 0x3a1   :  { %v260_v55 = vpack.c.bf16 %v258_v54, %v258_v54 }
 0x3a2   :  { %v1358_v56 = vpop.eup %1357 }
 0x3a3   :  { %v259_v58 = vmul.f32 %v1358_v56, %v1354_v48  ;;  %1236 = vmatmul.mubr.msk.bf16.vlgmr.msra.gmra.mrb[4].mxu1 %vm138_vm2, %v260_v55 }
 0x3a4   :  { %1246 = vmatpush3.bf16.xpose.msra.mxu1 %v370_v57  ;;  %1247 = vmatprep.mubr.msk.bf16.mxu1 %vm1485_vm0, %v1484_v0 }
 0x3a5   :  { %v261_v60 = vpack.c.bf16 %v259_v58, %v259_v58  ;;  %1257 = vmatprep.subr.bf16.mxu1 %v1484_v0 }
 0x3a7   :  { %1242 = vmatmul.mubr.msk.bf16.vlgmr.msra.gmra.mrb[8].mxu0 %vm138_vm2, %v261_v60 }
 0x3a8   :  { %1252 = vmatpush3.bf16.xpose.msra.mxu0 %v421_v61  ;;  %1253 = vmatprep.mubr.msk.bf16.mxu0 %vm1485_vm0, %v1484_v0 }
 0x3a9   :  { %1263 = vmatprep.subr.bf16.mxu0 %v1484_v0 }
 0x3ab   :  { %1248 = vmatmul.mubr.msk.bf16.vlgmr.msra.gmra.mrb[8].mxu1 %vm138_vm2, %v363_v62 }
 0x3ac   :  { %1259 = vmatprep.mubr.msk.bf16.mxu1 %vm1485_vm0, %v1484_v0 }
 0x3af   :  { %1254 = vmatmul.mubr.msk.bf16.vlgmr.msra.gmra.mrb[12].mxu0 %vm138_vm2, %v414_v63 }
 0x3b0   :  { %1265 = vmatprep.mubr.msk.bf16.mxu0 %vm1485_vm0, %v1484_v0 }
 0x476   :  { %v305_v1 = vpop.f32.mrb[4].mxu1 }
 0x477   :  { %359 = vst.msk [vmem:[#allocation2] sm:$0xff] %vm138_vm2, %v305_v1  ;;  %v1237_v2 = vpop.f32.mrb[5].mxu1 }
 0x478   :  { %v308_v3 = vpop.f32.mrb[6].mxu1 }
 0x479   :  { %v1238_v4 = vpop.f32.mrb[7].mxu1 }
 0x47a   :  { %v353_v5 = vpop.f32.mrb[8].mxu0 }
 0x47b   :  { %360 = vst.msk [vmem:[#allocation2 + $0x8] sm:$0xff] %vm138_vm2, %v353_v5  ;;  %v1243_v6 = vpop.f32.mrb[9].mxu0 }
 0x47c   :  { %v356_v8 = vpop.f32.mrb[10].mxu0 }
 0x47d   :  { %v1244_v9 = vpop.f32.mrb[11].mxu0 }
 0x47e   :  { %v406_v10 = vpop.f32.mrb[8].mxu1 }
 0x47f   :  { %v463_v12 = vsel %vm1602_vm3, %v406_v10, -1e+30  ;;  %v1249_v13 = vpop.f32.mrb[9].mxu1 }
 0x480   :  { %v409_v14 = vpop.f32.mrb[10].mxu1  ;;  %v465_v15 = vsel %vm138_vm2, %v463_v12, -inf }
 0x481   :  { %466 = vmax.xlane.f32.xlu1 %v465_v15  ;;  %v1250_v16 = vpop.f32.mrb[11].mxu1 }
 0x482   :  { %v457_v18 = vpop.f32.mrb[12].mxu0 }
 0x483   :  { %v464_v20 = vsel %vm1602_vm3, %v457_v18, -1e+30  ;;  %v1255_v21 = vpop.f32.mrb[13].mxu0 }
 0x484   :  { %v460_v22 = vpop.f32.mrb[14].mxu0  ;;  %v468_v24 = vsel %vm138_vm2, %v464_v20, -inf }
 0x485   :  { %469 = vmax.xlane.f32.xlu0 %v468_v24  ;;  %v1256_v25 = vpop.f32.mrb[15].mxu0 }
 0x492   :  { %489 = vrot.lane.b32.xlu1 %v1580_v7, %s1489_s29 }
 0x496   :  { %598 = vrot.lane.b32.xlu1 %v1580_v7, %s1490_s30 }
 0x49b   :  { %537 = vrot.lane.b32.xlu0 %v1583_v11, %s1489_s29 }
 0x49f   :  { %596 = vrot.lane.b32.xlu0 %v1589_v17, %s1491_s5 }
 0x50e   :  { %v467_v26 = vpop.xlane.xlu1 %466 }
 0x50f   :  { %v471_v27 = vsub.f32 %v463_v12, %v467_v26 }
 0x511   :  { %v473_v28 = vmul.f32 1.442695, %v471_v27 }
 0x512   :  { %v490_v29 = vpop.permute.xlu1 %489  ;;  %v470_v30 = vpop.xlane.xlu0 %469 }
 0x513   :  { %1359 = vpow2.f32 %v473_v28  ;;  %v495_v31 = vsel %vm267_vm4, %v490_v29, 0  ;;  %v472_v32 = vsub.f32 %v464_v20, %v470_v30 }
 0x514   :  { %1258 = vmatpush3.bf16.msra.mxu1 %v495_v31 }
 0x515   :  { %v475_v33 = vmul.f32 1.442695, %v472_v32  ;;  %1269 = vmatprep.subr.bf16.mxu1 %v1484_v0 }
 0x516   :  { %v538_v34 = vpop.permute.xlu0 %537  ;;  %v599_v40 = vpop.permute.xlu1 %598 }
 0x517   :  { %1361 = vpow2.f32 %v475_v33  ;;  %v543_v35 = vsel %vm267_vm4, %v538_v34, 0  ;;  %v604_v47 = vsel %vm138_vm2, %v599_v40, 0 }
 0x518   :  { %1264 = vmatpush3.bf16.msra.mxu0 %v543_v35 }
 0x519   :  { %1275 = vmatprep.subr.bf16.mxu0 %v1484_v0 }
 0x51a   :  { %v597_v52 = vpop.permute.xlu0 %596 }
 0x51d   :  { %v1360_v36 = vpop.eup %1359 }
 0x51e   :  { %v477_v37 = vsel %vm138_vm2, %v1360_v36, 0.0 }
 0x51f   :  { %478 = vadd.xlane.f32.xlu1 %v477_v37 }
 0x521   :  { %v1362_v38 = vpop.eup %1361 }
 0x522   :  { %v480_v39 = vsel %vm138_vm2, %v1362_v38, 0.0 }
 0x523   :  { %481 = vadd.xlane.f32.xlu1 %v480_v39 }
 0x534   :  { %648 = vrot.lane.b32.xlu1 %v1583_v11, %s1490_s30 }
 0x538   :  { %646 = vrot.lane.b32.xlu1 %v1596_v19, %s1491_s5 }
 0x5ac   :  { %v479_v41 = vpop.xlane.xlu1 %478 }
 0x5ad   :  { %1363 = vrcp.f32 %v479_v41 }
 0x5b0   :  { %v482_v42 = vpop.xlane.xlu1 %481 }
 0x5b1   :  { %1365 = vrcp.f32 %v482_v42 }
 0x5b4   :  { %v649_v49 = vpop.permute.xlu1 %648 }
 0x5b5   :  { %v654_v51 = vsel %vm138_vm2, %v649_v49, 0 }
 0x5b7   :  { %v1364_v43 = vpop.eup %1363 }
 0x5b8   :  { %v485_v44 = vmul.f32 %v1364_v43, %v1360_v36  ;;  %v647_v53 = vpop.permute.xlu1 %646 }
 0x5ba   :  { %v487_v45 = vpack.c.bf16 %v485_v44, %v485_v44 }
 0x5bb   :  { %v1366_v46 = vpop.eup %1365 }
 0x5bc   :  { %v486_v48 = vmul.f32 %v1366_v46, %v1362_v38  ;;  %1260 = vmatmul.mubr.msk.bf16.vlgmr.msra.gmra.mrb[12].mxu1 %vm138_vm2, %v487_v45 }
 0x5bd   :  { %1270 = vmatpush3.bf16.xpose.msra.mxu1 %v604_v47  ;;  %1271 = vmatprep.mubr.msk.bf16.mxu1 %vm1485_vm0, %v1484_v0 }
 0x5be   :  { %v488_v50 = vpack.c.bf16 %v486_v48, %v486_v48  ;;  %1281 = vmatprep.subr.bf16.mxu1 %v1484_v0 }
 0x5c0   :  { %1266 = vmatmul.mubr.msk.bf16.vlgmr.msra.gmra.mrb[16].mxu0 %vm138_vm2, %v488_v50 }
 0x5c1   :  { %1276 = vmatpush3.bf16.xpose.msra.mxu0 %v654_v51  ;;  %1277 = vmatprep.mubr.msk.bf16.mxu0 %vm1485_vm0, %v1484_v0 }
 0x5c2   :  { %1287 = vmatprep.subr.bf16.mxu0 %v1484_v0 }
 0x5c4   :  { %1272 = vmatmul.mubr.msk.bf16.vlgmr.msra.gmra.mrb[16].mxu1 %vm138_vm2, %v597_v52 }
 0x5c5   :  { %1283 = vmatprep.mubr.msk.bf16.mxu1 %vm1485_vm0, %v1484_v0 }
 0x5c8   :  { %1278 = vmatmul.mubr.msk.bf16.vlgmr.msra.gmra.mrb[20].mxu0 %vm138_vm2, %v647_v53 }
 0x5c9   :  { %1289 = vmatprep.mubr.msk.bf16.mxu0 %vm1485_vm0, %v1484_v0 }
 0x68f   :  { %v1678_v54 = vpop.f32.mrb[12].mxu1 }
 0x690   :  { %v1261_v55 = vpop.f32.mrb[13].mxu1 }
 0x691   :  { %v534_v56 = vpop.f32.mrb[14].mxu1 }
 0x692   :  { %v1262_v57 = vpop.f32.mrb[15].mxu1 }
 0x693   :  { %v1680_v58 = vpop.f32.mrb[16].mxu0 }
 0x694   :  { %v1267_v59 = vpop.f32.mrb[17].mxu0 }
 0x695   :  { %v582_v60 = vpop.f32.mrb[18].mxu0 }
 0x696   :  { %v1268_v61 = vpop.f32.mrb[19].mxu0 }
 0x697   :  { %v640_v62 = vpop.f32.mrb[16].mxu1 }
 0x698   :  { %v696_v63 = vsel %vm1602_vm3, %v640_v62, -1e+30  ;;  %v1273_v1 = vpop.f32.mrb[17].mxu1 }
 0x699   :  { %v643_v2 = vpop.f32.mrb[18].mxu1  ;;  %v698_v3 = vsel %vm138_vm2, %v696_v63, -inf }
 0x69a   :  { %699 = vmax.xlane.f32.xlu0 %v698_v3  ;;  %v1274_v4 = vpop.f32.mrb[19].mxu1 }
 0x69b   :  { %v690_v5 = vpop.f32.mrb[20].mxu0 }
 0x69c   :  { %v697_v6 = vsel %vm1602_vm3, %v690_v5, -1e+30  ;;  %v1279_v8 = vpop.f32.mrb[21].mxu0 }
 0x69d   :  { %v693_v9 = vpop.f32.mrb[22].mxu0  ;;  %v701_v10 = vsel %vm138_vm2, %v697_v6, -inf }
 0x69e   :  { %702 = vmax.xlane.f32.xlu1 %v701_v10  ;;  %v1280_v12 = vpop.f32.mrb[23].mxu0 }
 0x6af   :  { %722 = vrot.lane.b32.xlu1 %v1580_v7, %s1492_s6 }
 0x6b3   :  { %831 = vrot.lane.b32.xlu1 %v1580_v7, %s1493_s7 }
 0x6b7   :  { %881 = vrot.lane.b32.xlu1 %v1583_v11, %s1493_s7 }
 0x6bb   :  { %879 = vrot.lane.b32.xlu1 %v1596_v19, %s1494_s8 }
 0x727   :  { %v700_v13 = vpop.xlane.xlu0 %699 }
 0x728   :  { %v704_v14 = vsub.f32 %v696_v63, %v700_v13 }
 0x72a   :  { %v706_v15 = vmul.f32 1.442695, %v704_v14 }
 0x72b   :  { %v703_v16 = vpop.xlane.xlu1 %702 }
 0x72c   :  { %1367 = vpow2.f32 %v706_v15  ;;  %v705_v18 = vsub.f32 %v697_v6, %v703_v16 }
 0x72e   :  { %v708_v20 = vmul.f32 1.442695, %v705_v18 }
 0x72f   :  { %v723_v21 = vpop.permute.xlu1 %722 }
 0x730   :  { %1369 = vpow2.f32 %v708_v20  ;;  %v728_v22 = vsel %vm267_vm4, %v723_v21, 0 }
 0x731   :  { %1282 = vmatpush3.bf16.msra.mxu1 %v728_v22 }
 0x732   :  { %1293 = vmatprep.subr.bf16.mxu1 %v1484_v0 }
 0x733   :  { %v832_v32 = vpop.permute.xlu1 %831 }
 0x734   :  { %v837_v36 = vsel %vm138_vm2, %v832_v32, 0 }
 0x736   :  { %v1368_v24 = vpop.eup %1367 }
 0x737   :  { %v710_v25 = vsel %vm138_vm2, %v1368_v24, 0.0 }
 0x738   :  { %711 = vadd.xlane.f32.xlu0 %v710_v25 }
 0x73a   :  { %v1370_v26 = vpop.eup %1369 }
 0x73b   :  { %v713_v19 = vsel %vm138_vm2, %v1370_v26, 0.0 }
 0x73c   :  { %714 = vadd.xlane.f32.xlu0 %v713_v19  ;;  %v1349_v19 = vld [vmem:[#allocation8] sm:$0xff]  }
 0x752   :  { %770 = vrot.lane.b32.xlu0 %v1583_v11, %s1492_s6 }
 0x756   :  { %829 = vrot.lane.b32.xlu0 %v1589_v17, %s1494_s8  ;;  %v882_v17 = vpop.permute.xlu1 %881 }
 0x757   :  { %v887_v39 = vsel %vm138_vm2, %v882_v17, 0 }
 0x75a   :  { %v880_v41 = vpop.permute.xlu1 %879 }
 0x7c5   :  { %v712_v27 = vpop.xlane.xlu0 %711 }
 0x7c6   :  { %1371 = vrcp.f32 %v712_v27  ;;  %v1350_v27 = vld [vmem:[#allocation8 + $0x8] sm:$0xff]  }
 0x7c9   :  { %v715_v28 = vpop.xlane.xlu0 %714 }
 0x7ca   :  { %1373 = vrcp.f32 %v715_v28 }
 0x7cd   :  { %v771_v29 = vpop.permute.xlu0 %770 }
 0x7ce   :  { %v776_v30 = vsel %vm267_vm4, %v771_v29, 0 }
 0x7cf   :  { %1288 = vmatpush3.bf16.msra.mxu0 %v776_v30 }
 0x7d0   :  { %v1372_v31 = vpop.eup %1371  ;;  %1299 = vmatprep.subr.bf16.mxu0 %v1484_v0 }
 0x7d1   :  { %v718_v33 = vmul.f32 %v1372_v31, %v1368_v24  ;;  %v830_v40 = vpop.permute.xlu0 %829 }
 0x7d3   :  { %v720_v34 = vpack.c.bf16 %v718_v33, %v718_v33 }
 0x7d4   :  { %v1374_v35 = vpop.eup %1373 }
 0x7d5   :  { %v719_v37 = vmul.f32 %v1374_v35, %v1370_v26  ;;  %1284 = vmatmul.mubr.msk.bf16.vlgmr.msra.gmra.mrb[20].mxu1 %vm138_vm2, %v720_v34 }
 0x7d6   :  { %1294 = vmatpush3.bf16.xpose.msra.mxu1 %v837_v36  ;;  %1295 = vmatprep.mubr.msk.bf16.mxu1 %vm1485_vm0, %v1484_v0 }
 0x7d7   :  { %v721_v38 = vpack.c.bf16 %v719_v37, %v719_v37  ;;  %1305 = vmatprep.subr.bf16.mxu1 %v1484_v0 }
 0x7d9   :  { %1290 = vmatmul.mubr.msk.bf16.vlgmr.msra.gmra.mrb[24].mxu0 %vm138_vm2, %v721_v38 }
 0x7da   :  { %1300 = vmatpush3.bf16.xpose.msra.mxu0 %v887_v39  ;;  %1301 = vmatprep.mubr.msk.bf16.mxu0 %vm1485_vm0, %v1484_v0  ;;  %v1171_v39 = vld [vmem:[%s1766_s3] ss:$0 sm:$0xff] }
 0x7db   :  { %1311 = vmatprep.subr.bf16.mxu0 %v1484_v0 }
 0x7dd   :  { %1296 = vmatmul.mubr.msk.bf16.vlgmr.msra.gmra.mrb[24].mxu1 %vm138_vm2, %v830_v40 }
 0x7de   :  { %1307 = vmatprep.mubr.msk.bf16.mxu1 %vm1485_vm0, %v1484_v0 }
 0x7e1   :  { %1302 = vmatmul.mubr.msk.bf16.vlgmr.msra.gmra.mrb[28].mxu0 %vm138_vm2, %v880_v41 }
 0x7e2   :  { %1313 = vmatprep.mubr.msk.bf16.mxu0 %vm1485_vm0, %v1484_v0 }
 0x8a8   :  { %v764_v42 = vpop.f32.mrb[20].mxu1 }
 0x8a9   :  { %v1285_v43 = vpop.f32.mrb[21].mxu1 }
 0x8aa   :  { %v767_v44 = vpop.f32.mrb[22].mxu1 }
 0x8ab   :  { %v1286_v45 = vpop.f32.mrb[23].mxu1 }
 0x8ac   :  { %v812_v46 = vpop.f32.mrb[24].mxu0 }
 0x8ad   :  { %v1291_v47 = vpop.f32.mrb[25].mxu0 }
 0x8ae   :  { %v815_v48 = vpop.f32.mrb[26].mxu0 }
 0x8af   :  { %v1292_v49 = vpop.f32.mrb[27].mxu0 }
 0x8b0   :  { %v873_v50 = vpop.f32.mrb[24].mxu1 }
 0x8b1   :  { %v929_v51 = vsel %vm1602_vm3, %v873_v50, -1e+30  ;;  %v1297_v52 = vpop.f32.mrb[25].mxu1 }
 0x8b2   :  { %v876_v53 = vpop.f32.mrb[26].mxu1  ;;  %v931_v55 = vsel %vm138_vm2, %v929_v51, -inf }
 0x8b3   :  { %932 = vmax.xlane.f32.xlu0 %v931_v55  ;;  %v1298_v56 = vpop.f32.mrb[27].mxu1 }
 0x8b4   :  { %v923_v57 = vpop.f32.mrb[28].mxu0 }
 0x8b5   :  { %v930_v59 = vsel %vm1602_vm3, %v923_v57, -1e+30  ;;  %v1303_v60 = vpop.f32.mrb[29].mxu0 }
 0x8b6   :  { %v926_v61 = vpop.f32.mrb[30].mxu0  ;;  %v934_v62 = vsel %vm138_vm2, %v930_v59, -inf }
 0x8b7   :  { %935 = vmax.xlane.f32.xlu1 %v934_v62  ;;  %v1304_v63 = vpop.f32.mrb[31].mxu0 }
 0x8c8   :  { %955 = vrot.lane.b32.xlu1 %v1580_v7, %s1495_s9 }
 0x8cc   :  { %587 = vrot.lane.b32.xlu1 %v1678_v54, %s1482_s13 }
 0x8d0   :  { %589 = vrot.lane.b32.xlu1 %v1680_v58, %s1482_s13 }
 0x8d4   :  { %822 = vrot.lane.b32.xlu1 %v812_v46, %s1496_s10 }
 0x940   :  { %v933_v23 = vpop.xlane.xlu0 %932 }
 0x941   :  { %v937_v1 = vsub.f32 %v929_v51, %v933_v23 }
 0x943   :  { %v939_v2 = vmul.f32 1.442695, %v937_v1 }
 0x944   :  { %v936_v3 = vpop.xlane.xlu1 %935 }
 0x945   :  { %1375 = vpow2.f32 %v939_v2  ;;  %v938_v4 = vsub.f32 %v930_v59, %v936_v3 }
 0x947   :  { %v941_v5 = vmul.f32 1.442695, %v938_v4 }
 0x948   :  { %v956_v6 = vpop.permute.xlu1 %955 }
 0x949   :  { %1377 = vpow2.f32 %v941_v5  ;;  %v961_v8 = vsel %vm267_vm4, %v956_v6, 0 }
 0x94a   :  { %1306 = vmatpush3.bf16.msra.mxu1 %v961_v8 }
 0x94b   :  { %1317 = vmatprep.subr.bf16.mxu1 %v1484_v0 }
 0x94c   :  { %v588_v7 = vpop.permute.xlu1 %587 }
 0x94d   :  { %594 = vst.msk [vmem:[#allocation2] sm:$0xff] %vm593_vm5, %v588_v7 }
 0x94f   :  { %v1376_v54 = vpop.eup %1375 }
 0x950   :  { %v590_v58 = vpop.permute.xlu1 %589  ;;  %v943_v9 = vsel %vm138_vm2, %v1376_v54, 0.0 }
 0x951   :  { %595 = vst.msk [vmem:[#allocation2 + $0x8] sm:$0xff] %vm593_vm5, %v590_v58  ;;  %944 = vadd.xlane.f32.xlu0 %v943_v9 }
 0x953   :  { %v1378_v10 = vpop.eup %1377 }
 0x954   :  { %v823_v12 = vpop.permute.xlu1 %822  ;;  %v946_v13 = vsel %vm138_vm2, %v1378_v10, 0.0 }
 0x955   :  { %828 = vst.msk [vmem:[#allocation2 + $0x8] sm:$0xff] %vm826_vm6, %v823_v12  ;;  %947 = vadd.xlane.f32.xlu0 %v946_v13 }
 0x96b   :  { %1003 = vrot.lane.b32.xlu0 %v1583_v11, %s1495_s9 }
 0x96f   :  { %820 = vrot.lane.b32.xlu0 %v764_v42, %s1496_s10 }
 0x9de   :  { %v945_v14 = vpop.xlane.xlu0 %944 }
 0x9df   :  { %1379 = vrcp.f32 %v945_v14 }
 0x9e2   :  { %v948_v15 = vpop.xlane.xlu0 %947 }
 0x9e3   :  { %1381 = vrcp.f32 %v948_v15 }
 0x9e6   :  { %v1004_v16 = vpop.permute.xlu0 %1003 }
 0x9e7   :  { %v1009_v18 = vsel %vm267_vm4, %v1004_v16, 0 }
 0x9e8   :  { %1312 = vmatpush3.bf16.msra.mxu0 %v1009_v18 }
 0x9e9   :  { %v1380_v20 = vpop.eup %1379 }
 0x9ea   :  { %v951_v21 = vmul.f32 %v1380_v20, %v1376_v54  ;;  %v821_v22 = vpop.permute.xlu0 %820 }
 0x9eb   :  { %827 = vst.msk [vmem:[#allocation2] sm:$0xff] %vm826_vm6, %v821_v22 }
 0x9ec   :  { %v953_v24 = vpack.c.bf16 %v951_v21, %v951_v21 }
 0x9ed   :  { %v1382_v25 = vpop.eup %1381 }
 0x9ee   :  { %v952_v26 = vmul.f32 %v1382_v25, %v1378_v10  ;;  %1308 = vmatmul.mubr.msk.bf16.vlgmr.msra.gmra.mrb[28].mxu1 %vm138_vm2, %v953_v24 }
 0x9ef   :  { %1321 = vmatprep.mubr.msk.bf16.mxu1 %vm1485_vm0, %v1484_v0  ;;  %1318 = vmatpush3.bf16.msra.mxu1 %v1349_v19 }
 0x9f0   :  { %v954_v11 = vpack.c.bf16 %v952_v26, %v952_v26  ;;  %1319 = vmatprep.subr.bf16.mxu1 %v1484_v0 }
 0x9f2   :  { %1314 = vmatmul.mubr.msk.bf16.vlgmr.msra.gmra.mrb[32].mxu0 %vm138_vm2, %v954_v11 }
 0x9f3   :  { %1320 = vmatpush3.bf16.msra.mxu1 %v1350_v27 }
 0xac1   :  { %v997_v28 = vpop.f32.mrb[28].mxu1 }
 0xac2   :  { %1053 = vrot.lane.b32.xlu0 %v997_v28, %s1497_s11  ;;  %v1309_v29 = vpop.f32.mrb[29].mxu1 }
 0xac3   :  { %v1000_v30 = vpop.f32.mrb[30].mxu1 }
 0xac4   :  { %v1310_v31 = vpop.f32.mrb[31].mxu1 }
 0xac5   :  { %v1045_v32 = vpop.f32.mrb[32].mxu0 }
 0xac6   :  { %1055 = vrot.lane.b32.xlu1 %v1045_v32, %s1497_s11  ;;  %v1315_v33 = vpop.f32.mrb[33].mxu0 }
 0xac7   :  { %v1048_v34 = vpop.f32.mrb[34].mxu0 }
 0xac8   :  { %v1316_v35 = vpop.f32.mrb[35].mxu0 }
 0xb34   :  { %v1054_v36 = vpop.permute.xlu0 %1053 }
 0xb35   :  { %1060 = vst.msk [vmem:[#allocation2] sm:$0xff] %vm1059_vm7, %v1054_v36 }
 0xb38   :  { %v1056_v37 = vpop.permute.xlu1 %1055 }
 0xb39   :  { %1061 = vst.msk [vmem:[#allocation2 + $0x8] sm:$0xff] %vm1059_vm7, %v1056_v37 }
 0xb3c   :  { %v1062_v17 = vld [vmem:[#allocation2] sm:$0xff] }
 0xb40   :  { %v1063_v38 = vld [vmem:[#allocation2 + $0x8] sm:$0xff] }
 0xb41   :  { %v1064_v0 = vpack.c.bf16 %v1063_v38, %v1062_v17 }
 0xb43   :  { %1322 = vmatmul.mubr.msk.bf16.vlgmr.msra.gmra.mrb[32].mxu1 %vm79_vm1, %v1064_v0 }
 0xc16   :  { %v1125_v40 = vpop.f32.mrb[32].mxu1 }
 0xc17   :  { %v1126_v41 = vadd.f32 %v1171_v39, %v1125_v40  ;;  %v1323_v42 = vpop.f32.mrb[33].mxu1 }
 0xc18   :  { %v1128_v43 = vpop.f32.mrb[34].mxu1 }
 0xc19   :  { %1132 = vst.msk [vmem:[#allocation9] sm:$0xff] %vm79_vm1, %v1126_v41  ;;  %v1129_v44 = vadd.f32 %v1171_v39, %v1128_v43  ;;  %v1324_v45 = vpop.f32.mrb[35].mxu1 }
 0xc1b   :  { %1133 = vst.msk [vmem:[#allocation9 + $0x8] sm:$0xff] %vm79_vm1, %v1129_v44 }
 0xc1c   :  { %1460 = shalt.err (!%p1457_p0)
}
 0xc1d   :  { %s1461_s19 = scalar_lea.hbm %s1767_s4, 256 }
 0xc1e   :  { %p1462_p1 = scmp.ne.s32.totalorder %s1767_s4, %s1461_s19  ;;  %p1465_p2 = scmp.lt.u32.totalorder %s1461_s19, %s1767_s4 }
 0xc20   :  { %p1467_p3 = pnand %p1465_p2, %p1462_p1 }
 0xc22   :  { %1470 = shalt.err (!%p1467_p3)
}
 0xc23   :  { %1145 = dma.vmem_to_hbm [thread:$0]  %s1140_s16, 256, %s1767_s4, [#allocation5], %s1481_s1, %s1481_s1, %s1482_s13  }
 0xc24   :  { %1475 = dma.done.wait [#allocation5], 256  }
 0xc25   :  { %1476 = vsyncadd [#allocation5], 4294967040 }
 0xc26   :  { %1149 = vsyncpa [#allocation4], 1 }
 0xc27   :  { %1150 = vsyncpa [#allocation7], 1 }
 0xc28   :  { %1151 = vsyncpa [#allocation5], 1 }

</bundles_post_ra>
